<compile_context>
chip_gen: v7x
topology: tpu7x:2x2x1
jax: 0.10.0
libtpu: 0.0.40
codegen_flags: <defaults>
</compile_context>

<pallas_src>
import jax
import jax.numpy as jnp
from jax import lax
from jax.experimental import pallas as pl
from jax.experimental.pallas import tpu as pltpu


def cnn_my_pool_kernel(x_ref, o_ref):
    """x_ref: (rb, 16*W) packed input rows; o_ref: (rb, W//4 + 2) output rows."""
    x = x_ref[...]
    W = x.shape[1] // 16

    # ---- H chain -----------------------------------------------------------
    # Four kernel-2/stride-2 H pools compose to a max over the 16 W-wide lane
    # groups of each row.  First combine h with h+8 via an aligned slice
    # maximum (pure VPU when 8W is a multiple of 128), then a circular roll
    # butterfly with shifts {4W, 2W, W}.  All shifts are multiples of W, so
    # lanes only ever combine within their own W-group, and the subset sums of
    # {4W, 2W, W} cover all 8 remaining offsets -> after the loop every lane
    # holds its group max (independent of roll direction).
    y = jnp.maximum(x[:, :8 * W], x[:, 8 * W:])
    for s in (4 * W, 2 * W, W):
        y = jnp.maximum(y, pltpu.roll(y, shift=s, axis=1))
    xh = y[:, :W]                                            # (rb, W)

    # ---- W chain -----------------------------------------------------------
    # pool1 twice along W (kernel 2, stride 2, floor) == max over groups of 4.
    m = W // 4
    c = jnp.concatenate(
        [jnp.max(xh[:, 4 * q:4 * q + 4], axis=1, keepdims=True)
         for q in range(m)],
        axis=1)                                              # (rb, m)

    # pool2 along W (kernel 2, stride 1, pad 1): the -inf pad never wins, so
    # out[0] = a[0], out[j] = max(a[j-1], a[j]), out[-1] = a[-1] -- shifted max
    # plus explicit boundary columns, no padded temporary, dtype-agnostic.
    def pool_w_k2_s1_p1(b):
        n = b.shape[1]
        if n == 1:
            return jnp.concatenate([b, b], axis=1)
        mid = jnp.maximum(b[:, :n - 1], b[:, 1:])
        return jnp.concatenate([b[:, 0:1], mid, b[:, n - 1:n]], axis=1)

    e = pool_w_k2_s1_p1(pool_w_k2_s1_p1(c))                  # (rb, m + 2)
    o_ref[...] = e


def _out_hw(h, w):
    # Mirrors PyTorch's floor-mode pooling arithmetic for the four pools.
    h1, w1 = h // 2, w // 2
    h2, w2 = h1 // 2, w1 // 2
    h3 = (h2 - 2) // 2 + 1
    w3 = w2 + 1
    h4 = (h3 - 2) // 2 + 1
    w4 = w3 + 1
    return h4, w4


def _round_up(x, m):
    return (x + m - 1) // m * m


def _pick_row_block(n_rows, row_bytes, block_bytes):
    """Rows per grid step: ~block_bytes per buffer, multiple of 8, >=2 steps."""
    rb = min(n_rows, max(8, block_bytes // max(row_bytes, 1)))
    if n_rows > 8:
        rb = min(rb, (n_rows + 1) // 2)      # >=2 grid steps (v7x megacore)
    if rb < n_rows:
        rb = max(8, (rb // 8) * 8)           # (8,128) rule unless full extent
        rb = min(rb, n_rows)
    return rb


def cnn_my_forward(x_nchw, *, block_bytes=2 << 20):
    """Input/output are NCHW (PyTorch convention)."""
    N, C, H, W = x_nchw.shape
    assert H >= 16 and W >= 4, "four chained pools need H >= 16 and W >= 4"
    Hout, Wout = _out_hw(H, W)
    # For H >= 16 the composed H-chain is a max over disjoint 16-row windows.
    assert Hout == H // 16 and Wout == W // 4 + 2

    if H != 16 * Hout:
        # Floor-mode pooling ignores the trailing H rows.
        x_nchw = x_nchw[:, :, :16 * Hout, :]

    n_rows = N * C * Hout
    # Free reshape of the contiguous NCHW buffer: one row == the 16 input rows
    # that produce one output row, packed along lanes (16*W lanes per row).
    x2d = x_nchw.reshape(n_rows, 16 * W)

    itemsize = jnp.dtype(x_nchw.dtype).itemsize
    row_bytes = _round_up(16 * W, 128) * itemsize        # lane-padded VMEM row
    rb = _pick_row_block(n_rows, row_bytes, block_bytes)
    grid = (pl.cdiv(n_rows, rb),)

    in_block_bytes = rb * row_bytes
    out_block_bytes = rb * _round_up(Wout, 128) * itemsize
    # ~2x the double-buffered footprint of headroom; stays within every chip's
    # default scoped limit (16 MiB v5e, 32 MiB v6e/v7x) and well under v7x's
    # 64 MiB physical VMEM.
    vmem_limit = int(min(32 << 20,
                         max(16 << 20, 4 * (in_block_bytes + out_block_bytes))))

    cost = pl.CostEstimate(
        flops=2 * N * C * H * W,             # ~a couple of compares per element
        transcendentals=0,
        bytes_accessed=int(x_nchw.size) * itemsize + n_rows * Wout * itemsize,
    )

    out2d = pl.pallas_call(
        cnn_my_pool_kernel,
        out_shape=jax.ShapeDtypeStruct((n_rows, Wout), x_nchw.dtype),
        grid=grid,
        in_specs=[pl.BlockSpec((rb, 16 * W), lambda i: (i, 0))],
        out_specs=pl.BlockSpec((rb, Wout), lambda i: (i, 0)),
        compiler_params=pltpu.CompilerParams(
            dimension_semantics=("parallel",),
            vmem_limit_bytes=vmem_limit),
        cost_estimate=cost,
    )(x2d)

    # Free reshape back to NCHW: row index already equals ((n*C + c)*Hout + h).
    return out2d.reshape(N, C, Hout, Wout)


def ref_forward(x_nchw):
    """Pure-JAX reference (lax.reduce_window) matching nn.MaxPool2d semantics."""
    neg = -jnp.inf
    y = lax.reduce_window(x_nchw, neg, lax.max, (1, 1, 2, 2), (1, 1, 2, 2), "VALID")
    y = lax.reduce_window(y, neg, lax.max, (1, 1, 2, 2), (1, 1, 2, 2), "VALID")
    pad = ((0, 0), (0, 0), (0, 0), (1, 1))
    y = lax.reduce_window(y, neg, lax.max, (1, 1, 2, 2), (1, 1, 2, 1), pad)
    y = lax.reduce_window(y, neg, lax.max, (1, 1, 2, 2), (1, 1, 2, 1), pad)
    return y


if __name__ == "__main__":
    key = jax.random.PRNGKey(0)
    # The module has no learnable parameters (only pooling layers).
    x = jax.random.normal(key, (2, 4, 16, 16), dtype=jnp.float32)

    out = jax.block_until_ready(cnn_my_forward(x))
    ref = ref_forward(x)
    assert out.shape == (2, 4, 1, 6), out.shape
    assert out.dtype == x.dtype
    assert jnp.allclose(out, ref), "Pallas output mismatch vs reference"

    # Second (slightly larger) shape: exercises the multi-step row grid.
    x2 = jax.random.normal(jax.random.PRNGKey(1), (2, 4, 48, 16), dtype=jnp.float32)
    out2 = jax.block_until_ready(cnn_my_forward(x2))
    ref2 = ref_forward(x2)
    assert out2.shape == (2, 4, 3, 6), out2.shape
    assert jnp.allclose(out2, ref2), "Pallas output mismatch vs reference (multi-block)"

    print("KERNEL_OK")
</pallas_src>

<mosaic_0001>
module attributes {stable_mosaic.version = 11 : i64} {
  func.func @cnn_my_pool_kernel(%arg0: i32, %arg1: memref<8x256xf32, #tpu.memory_space<vmem>>, %arg2: memref<8x6xf32, #tpu.memory_space<vmem>>) attributes {dimension_semantics = [#tpu.dimension_semantics<parallel>], iteration_bounds = array<i64: 1>, scalar_prefetch = 0 : i64, scratch_operands = 0 : i64, tpu.core_type = #tpu.core_type<tc>, window_params = [{transform_indices = @transform_0, window_bounds = array<i64: 8, 256>}, {transform_indices = @transform_1, window_bounds = array<i64: 8, 6>}]} {
    %c0 = arith.constant 0 : index
    %c0_0 = arith.constant 0 : index
    %0 = vector.load %arg1[%c0, %c0_0] : memref<8x256xf32, #tpu.memory_space<vmem>>, vector<8x256xf32>
    %1 = vector.extract_strided_slice %0 {offsets = [0, 0], sizes = [8, 128], strides = [1, 1]} : vector<8x256xf32> to vector<8x128xf32>
    %2 = vector.extract_strided_slice %0 {offsets = [0, 128], sizes = [8, 128], strides = [1, 1]} : vector<8x256xf32> to vector<8x128xf32>
    %3 = arith.maximumf %1, %2 : vector<8x128xf32>
    %c64_i32 = arith.constant 64 : i32
    %4 = tpu.dynamic_rotate %3 by %c64_i32 dim 1 : vector<8x128xf32>, i32 -> vector<8x128xf32>
    %5 = arith.maximumf %3, %4 : vector<8x128xf32>
    %c32_i32 = arith.constant 32 : i32
    %6 = tpu.dynamic_rotate %5 by %c32_i32 dim 1 : vector<8x128xf32>, i32 -> vector<8x128xf32>
    %7 = arith.maximumf %5, %6 : vector<8x128xf32>
    %c16_i32 = arith.constant 16 : i32
    %8 = tpu.dynamic_rotate %7 by %c16_i32 dim 1 : vector<8x128xf32>, i32 -> vector<8x128xf32>
    %9 = arith.maximumf %7, %8 : vector<8x128xf32>
    %10 = vector.extract_strided_slice %9 {offsets = [0, 0], sizes = [8, 16], strides = [1, 1]} : vector<8x128xf32> to vector<8x16xf32>
    %11 = vector.extract_strided_slice %10 {offsets = [0, 0], sizes = [8, 4], strides = [1, 1]} : vector<8x16xf32> to vector<8x4xf32>
    %cst = arith.constant dense<0xFF800000> : vector<8xf32>
    %12 = vector.multi_reduction <maximumf>, %11, %cst [1] : vector<8x4xf32> to vector<8xf32>
    %13 = vector.shape_cast %12 : vector<8xf32> to vector<8x1xf32>
    %14 = vector.extract_strided_slice %10 {offsets = [0, 4], sizes = [8, 4], strides = [1, 1]} : vector<8x16xf32> to vector<8x4xf32>
    %cst_1 = arith.constant dense<0xFF800000> : vector<8xf32>
    %15 = vector.multi_reduction <maximumf>, %14, %cst_1 [1] : vector<8x4xf32> to vector<8xf32>
    %16 = vector.shape_cast %15 : vector<8xf32> to vector<8x1xf32>
    %17 = vector.extract_strided_slice %10 {offsets = [0, 8], sizes = [8, 4], strides = [1, 1]} : vector<8x16xf32> to vector<8x4xf32>
    %cst_2 = arith.constant dense<0xFF800000> : vector<8xf32>
    %18 = vector.multi_reduction <maximumf>, %17, %cst_2 [1] : vector<8x4xf32> to vector<8xf32>
    %19 = vector.shape_cast %18 : vector<8xf32> to vector<8x1xf32>
    %20 = vector.extract_strided_slice %10 {offsets = [0, 12], sizes = [8, 4], strides = [1, 1]} : vector<8x16xf32> to vector<8x4xf32>
    %cst_3 = arith.constant dense<0xFF800000> : vector<8xf32>
    %21 = vector.multi_reduction <maximumf>, %20, %cst_3 [1] : vector<8x4xf32> to vector<8xf32>
    %22 = vector.shape_cast %21 : vector<8xf32> to vector<8x1xf32>
    %23 = tpu.concatenate %13, %16, %19, %22 in 1 : vector<8x1xf32>, vector<8x1xf32>, vector<8x1xf32>, vector<8x1xf32> -> vector<8x4xf32>
    %24 = vector.extract_strided_slice %23 {offsets = [0, 0], sizes = [8, 3], strides = [1, 1]} : vector<8x4xf32> to vector<8x3xf32>
    %25 = vector.extract_strided_slice %23 {offsets = [0, 1], sizes = [8, 3], strides = [1, 1]} : vector<8x4xf32> to vector<8x3xf32>
    %26 = arith.maximumf %24, %25 : vector<8x3xf32>
    %27 = vector.extract_strided_slice %23 {offsets = [0, 0], sizes = [8, 1], strides = [1, 1]} : vector<8x4xf32> to vector<8x1xf32>
    %28 = vector.extract_strided_slice %23 {offsets = [0, 3], sizes = [8, 1], strides = [1, 1]} : vector<8x4xf32> to vector<8x1xf32>
    %29 = tpu.concatenate %27, %26, %28 in 1 : vector<8x1xf32>, vector<8x3xf32>, vector<8x1xf32> -> vector<8x5xf32>
    %30 = vector.extract_strided_slice %29 {offsets = [0, 0], sizes = [8, 4], strides = [1, 1]} : vector<8x5xf32> to vector<8x4xf32>
    %31 = vector.extract_strided_slice %29 {offsets = [0, 1], sizes = [8, 4], strides = [1, 1]} : vector<8x5xf32> to vector<8x4xf32>
    %32 = arith.maximumf %30, %31 : vector<8x4xf32>
    %33 = vector.extract_strided_slice %29 {offsets = [0, 0], sizes = [8, 1], strides = [1, 1]} : vector<8x5xf32> to vector<8x1xf32>
    %34 = vector.extract_strided_slice %29 {offsets = [0, 4], sizes = [8, 1], strides = [1, 1]} : vector<8x5xf32> to vector<8x1xf32>
    %35 = tpu.concatenate %33, %32, %34 in 1 : vector<8x1xf32>, vector<8x4xf32>, vector<8x1xf32> -> vector<8x6xf32>
    %c0_4 = arith.constant 0 : index
    %c0_5 = arith.constant 0 : index
    %36 = vector.load %arg2[%c0_4, %c0_5] : memref<8x6xf32, #tpu.memory_space<vmem>>, vector<8x6xf32>
    tpu.vector_store %arg2[%c0_4, %c0_5], %35 {strides = array<i32>} : memref<8x6xf32, #tpu.memory_space<vmem>>, vector<8x6xf32>,
    return
  }
  func.func @transform_0(%arg0: i32) -> (i32, i32) {
    %c0_i32 = arith.constant 0 : i32
    %c0_i32_0 = arith.constant 0 : i32
    return %arg0, %c0_i32 : i32, i32
  }
  func.func @transform_1(%arg0: i32) -> (i32, i32) {
    %c0_i32 = arith.constant 0 : i32
    %c0_i32_0 = arith.constant 0 : i32
    return %arg0, %c0_i32 : i32, i32
  }
}

</mosaic_0001>

<bundles_post_ra>
// kernel: tpu_custom_call.1
= control target key start
LH: loop header
LB: loop body
LE: loop exit
PB: predicated region body
PF: predicated region fallthrough
CT: control target
= control target key end

     0   :  { %6 = vsyncpa [#allocation3], 0  ;;  %s202_s0 = inlined_call_operand.hbm [shape: f32[8,256], index: 0, kind: input, shape index: {}]   ;;  %s203_s1 = inlined_call_operand.hbm [shape: f32[8,6], index: 1, kind: output, shape index: {}]  }
   0x1   :  { %7 = vsyncpa [#allocation4], 0  ;;  %s156_s6 = smov [#allocation2]   ;;  %s108_s10 = scalar_lea.hbm %s202_s0, 256 }
   0x2   :  { %s14_s7 = sshll.u32 %s156_s6, 4  ;;  %p109_p0 = scmp.ne.s32.totalorder %s202_s0, %s108_s10  ;;  %s15_s7 = int_to_ptr.vmem [resolvable:$true] %s14_s7 }
   0x3   :  { %p112_p1 = scmp.lt.u32.totalorder %s108_s10, %s202_s0 }
   0x5   :  { %p114_p2 = pnand %p112_p1, %p109_p0 }
   0x7   :  { %117 = shalt.err (!%p114_p2)
}
   0x8   :  { %s118_s15 = scalar_lea.vmem %s15_s7, 256  ;;  %p123_p4 = scmp.lt.s32.totalorder %s15_s7, %s15_s7 }
   0x9   :  { %p119_p3 = scmp.ne.s32.totalorder %s15_s7, %s118_s15  ;;  %p124_p5 = scmp.lt.s32.totalorder %s118_s15, %s118_s15 }
   0xb   :  { %p125_p6 = por %p124_p5, %p123_p4 }
   0xd   :  { %p126_p7 = pnand %p125_p6, %p119_p3 }
   0xf   :  { %129 = shalt.err (!%p126_p7)
}
  0x10   :  { %17 = dma.hbm_to_vmem [thread:$0]  %s202_s0, 256, %s15_s7, [#allocation3]  }
  0x11   :  { %152 = dma.done.wait [#allocation3], 256  }
  0x12   :  { %153 = vsyncadd [#allocation3], 4294967040  ;;  %v21_v0 = vld [vmem:[#allocation2] sm:$0xff]  ;;  %v22_v1 = vld [vmem:[#allocation2 + $0x8] sm:$0xff]  ;;  %s157_s18 = smov 64   ;;  %s158_s19 = smov 32  }
  0x13   :  { %v23_v2 = vmax.f32 %v21_v0, %v22_v1  ;;  %s159_s20 = smov 16   ;;  %vm37_vm0 = vcmask 64544   ;;  %vm33_vm1 = vcmask 31744   ;;  %vm41_vm2 = vcmask 97344   ;;  %s160_s0 = smov 127  }
  0x14   :  { %vm45_vm3 = vcmask 130144   ;;  %vm49_vm4 = vcmask 7168   ;;  %vm51_vm5 = vcmask 15360   ;;  %vm53_vm6 = vcmask 23552   ;;  %s161_s21 = smov 1   ;;  %s162_s22 = smov [#allocation5]  }
  0x15   :  { %24 = vrot.lane.b32.xlu0 %v23_v2, %s157_s18  ;;  %s92_s23 = sshll.u32 %s162_s22, 4  ;;  %vm82_vm7 = vcmask 39936   ;;  %vm84_vm8 = vcmask 48128   ;;  %s93_s23 = int_to_ptr.vmem [resolvable:$true] %s92_s23 }
  0x16   :  { %s130_s24 = scalar_lea.vmem %s93_s23, 128  ;;  %p135_p9 = scmp.lt.s32.totalorder %s93_s23, %s93_s23 }
  0x17   :  { %p131_p8 = scmp.ne.s32.totalorder %s93_s23, %s130_s24  ;;  %p136_p10 = scmp.lt.s32.totalorder %s130_s24, %s130_s24 }
  0x19   :  { %p137_p11 = por %p136_p10, %p135_p9 }
  0x1b   :  { %p138_p12 = pnand %p137_p11, %p131_p8 }
  0x87   :  { %v25_v3 = vpop.permute.xlu0 %24 }
  0x88   :  { %v26_v4 = vmax.f32 %v23_v2, %v25_v3 }
  0x8a   :  { %27 = vrot.lane.b32.xlu0 %v26_v4, %s158_s19 }
  0xfc   :  { %v28_v5 = vpop.permute.xlu0 %27 }
  0xfd   :  { %v29_v6 = vmax.f32 %v26_v4, %v28_v5 }
  0xff   :  { %30 = vrot.lane.b32.xlu1 %v29_v6, %s159_s20 }
 0x171   :  { %v31_v7 = vpop.permute.xlu1 %30 }
 0x172   :  { %v32_v8 = vmax.f32 %v29_v6, %v31_v7 }
 0x174   :  { %v38_v9 = vsel %vm37_vm0, %v32_v8, -inf  ;;  %v34_v10 = vsel %vm33_vm1, %v32_v8, -inf  ;;  %v42_v11 = vsel %vm41_vm2, %v32_v8, -inf  ;;  %v46_v12 = vsel %vm45_vm3, %v32_v8, -inf }
 0x175   :  { %39 = vmax.xlane.f32.xlu0 %v38_v9  ;;  %35 = vmax.xlane.f32.xlu1 %v34_v10 }
 0x179   :  { %43 = vmax.xlane.f32.xlu0 %v42_v11  ;;  %47 = vmax.xlane.f32.xlu1 %v46_v12 }
 0x202   :  { %v40_v13 = vpop.xlane.xlu0 %39  ;;  %v36_v14 = vpop.xlane.xlu1 %35 }
 0x203   :  { %v50_v15 = vsel %vm49_vm4, %v36_v14, %v40_v13 }
 0x206   :  { %v44_v16 = vpop.xlane.xlu0 %43  ;;  %v48_v17 = vpop.xlane.xlu1 %47 }
 0x207   :  { %v52_v18 = vsel %vm51_vm5, %v50_v15, %v44_v16 }
 0x208   :  { %v54_v19 = vsel %vm53_vm6, %v52_v18, %v48_v17 }
 0x209   :  { %56 = vrot.lane.b32.xlu0 %v54_v19, %s160_s0 }
 0x27b   :  { %v57_v20 = vpop.permute.xlu0 %56 }
 0x27c   :  { %v59_v21 = vmax.f32 %v54_v19, %v57_v20 }
 0x27e   :  { %61 = vrot.lane.b32.xlu1 %v59_v21, %s161_s21 }
 0x282   :  { %64 = vrot.lane.b32.xlu1 %v54_v19, %s161_s21 }
 0x2f0   :  { %v62_v22 = vpop.permute.xlu1 %61 }
 0x2f1   :  { %v67_v23 = vsel %vm49_vm4, %v54_v19, %v62_v22 }
 0x2f4   :  { %v65_v24 = vpop.permute.xlu1 %64 }
 0x2f5   :  { %v68_v25 = vsel %vm33_vm1, %v67_v23, %v65_v24 }
 0x2f6   :  { %70 = vrot.lane.b32.xlu0 %v68_v25, %s160_s0 }
 0x2fa   :  { %78 = vrot.lane.b32.xlu0 %v68_v25, %s161_s21 }
 0x368   :  { %v71_v26 = vpop.permute.xlu0 %70 }
 0x369   :  { %v73_v27 = vmax.f32 %v68_v25, %v71_v26 }
 0x36b   :  { %75 = vrot.lane.b32.xlu1 %v73_v27, %s161_s21 }
 0x36c   :  { %v79_v29 = vpop.permute.xlu0 %78 }
 0x3dd   :  { %v76_v28 = vpop.permute.xlu1 %75 }
 0x3de   :  { %v81_v30 = vsel %vm49_vm4, %v68_v25, %v76_v28 }
 0x3df   :  { %v83_v31 = vsel %vm82_vm7, %v81_v30, %v79_v29 }
 0x3e0   :  { %85 = vst.msk [vmem:[#allocation5] sm:$0xff] %vm84_vm8, %v83_v31 }
 0x3e1   :  { %141 = shalt.err (!%p138_p12)
}
 0x3e2   :  { %s142_s27 = scalar_lea.hbm %s203_s1, 128 }
 0x3e3   :  { %p143_p13 = scmp.ne.s32.totalorder %s203_s1, %s142_s27  ;;  %p146_p0 = scmp.lt.u32.totalorder %s142_s27, %s203_s1 }
 0x3e5   :  { %p148_p1 = pnand %p146_p0, %p143_p13 }
 0x3e7   :  { %151 = shalt.err (!%p148_p1)
}
 0x3e8   :  { %95 = dma.vmem_to_hbm [thread:$0]  %s93_s23, 128, %s203_s1, [#allocation4]  }
 0x3e9   :  { %154 = dma.done.wait [#allocation4], 128  }
 0x3ea   :  { %155 = vsyncadd [#allocation4], 4294967168 }
 0x3eb   :  { %99 = vsyncpa [#allocation3], 1 }
 0x3ec   :  { %100 = vsyncpa [#allocation4], 1 }

</bundles_post_ra>
